<compile_context>
chip_gen: v7x
topology: tpu7x:2x2x1
jax: 0.10.0
libtpu: 0.0.40
codegen_flags: <defaults>
</compile_context>

<pallas_src>
import jax
import jax.numpy as jnp
from jax.experimental import pallas as pl
from jax.experimental.pallas import tpu as pltpu

Z_DIM = 2
H_DIM = 512
X_DIM = 784
X_PAD = 896            # 7 * 128 -> lane-dense MXU N-dim and unmasked stores
DEFAULT_TB = 512       # safe on v5e (16 MiB scoped VMEM); fine on v6e/v7x


def decoder_kernel(z_ref, w3_ref, b3_ref, w4_ref, b4_ref, o_ref):
    z = z_ref[...]                       # (TB, 2)   f32
    w3 = w3_ref[...]                     # (2, 512)  f32

    # fc3 (K=2) on the VPU: two broadcast FMAs instead of an MXU matmul.
    h = z[:, 0:1] * w3[0:1, :] + z[:, 1:2] * w3[1:2, :] + b3_ref[...]
    h = jnp.maximum(h, 0.0)              # ReLU, f32

    # fc4 on the MXU: bf16 inputs, f32 accumulation.
    y = jnp.dot(h.astype(jnp.bfloat16), w4_ref[...],
                preferred_element_type=jnp.float32)
    o_ref[...] = jax.nn.sigmoid(y + b4_ref[...])   # bias + sigmoid in f32


def decoder_forward(z, w3_t, b3, w4_t, b4, *, tb=DEFAULT_TB):
    """z: (B, 2) f32 -> (B, 784) f32.

    Weights are stored pre-transposed: w3_t (2, 512), w4_t (512, 784),
    b3 (1, 512), b4 (1, 784)  (i.e. W^T relative to PyTorch's (out, in)).
    """
    B = z.shape[0]

    # Pad fc4 weights/bias to a lane-dense output width (done once per call;
    # in a real model these would be stored pre-padded).
    w4_p = jnp.pad(w4_t, ((0, 0), (0, X_PAD - X_DIM))).astype(jnp.bfloat16)
    b4_p = jnp.pad(b4, ((0, 0), (0, X_PAD - X_DIM))).astype(jnp.float32)

    # Choose a batch tile: multiple of 8 (sublane), capped at `tb`.
    tile_b = min(tb, max(8, ((B + 7) // 8) * 8))
    b_pad = ((B + tile_b - 1) // tile_b) * tile_b
    if b_pad != B:
        z = jnp.pad(z, ((0, b_pad - B), (0, 0)))

    grid = (b_pad // tile_b,)

    out = pl.pallas_call(
        decoder_kernel,
        out_shape=jax.ShapeDtypeStruct((b_pad, X_PAD), jnp.float32),
        grid_spec=pltpu.PrefetchScalarGridSpec(
            num_scalar_prefetch=0,
            grid=grid,
            in_specs=[
                pl.BlockSpec((tile_b, Z_DIM), lambda i: (i, 0)),   # z tile
                pl.BlockSpec((Z_DIM, H_DIM), lambda i: (0, 0)),    # w3 resident
                pl.BlockSpec((1, H_DIM), lambda i: (0, 0)),        # b3 resident
                pl.BlockSpec((H_DIM, X_PAD), lambda i: (0, 0)),    # w4 resident
                pl.BlockSpec((1, X_PAD), lambda i: (0, 0)),        # b4 resident
            ],
            out_specs=pl.BlockSpec((tile_b, X_PAD), lambda i: (i, 0)),
        ),
        compiler_params=pltpu.CompilerParams(
            dimension_semantics=("parallel",),   # shard batch across TCs (v7x)
        ),
    )(z, w3_t, b3, w4_p, b4_p)

    # Strip batch padding and the 784->896 feature padding outside the kernel.
    return out[:B, :X_DIM]


def init_params(key):
    """Deterministic init mimicking nn.Linear's uniform(-1/sqrt(fan_in), +...)."""
    k3w, k3b, k4w, k4b = jax.random.split(key, 4)
    bound3 = 1.0 / jnp.sqrt(Z_DIM)
    bound4 = 1.0 / jnp.sqrt(H_DIM)
    # stored as (in, out) == W^T relative to PyTorch's (out, in)
    w3_t = jax.random.uniform(k3w, (Z_DIM, H_DIM), jnp.float32, -bound3, bound3)
    b3 = jax.random.uniform(k3b, (1, H_DIM), jnp.float32, -bound3, bound3)
    w4_t = jax.random.uniform(k4w, (H_DIM, X_DIM), jnp.float32, -bound4, bound4)
    b4 = jax.random.uniform(k4b, (1, X_DIM), jnp.float32, -bound4, bound4)
    return w3_t, b3, w4_t, b4


if __name__ == "__main__":
    key = jax.random.PRNGKey(0)
    kz, kp = jax.random.split(key)

    batch = 8
    z = jax.random.normal(kz, (batch, Z_DIM), jnp.float32)
    w3_t, b3, w4_t, b4 = init_params(kp)

    out = decoder_forward(z, w3_t, b3, w4_t, b4)
    out = jax.block_until_ready(out)
    assert out.shape == (batch, X_DIM)

    # Reference in plain JAX (f32). Kernel uses bf16 weights on the MXU with
    # f32 accumulation, so allow a bf16-level tolerance (outputs are in [0,1]).
    ref_f32 = jax.nn.sigmoid(jnp.maximum(z @ w3_t + b3, 0.0) @ w4_t + b4)
    assert jnp.allclose(out, ref_f32, atol=1e-2, rtol=1e-2)

    # Tighter check against a bf16-matmul reference (same arithmetic path).
    h_ref = jnp.maximum(z @ w3_t + b3, 0.0)
    ref_bf16 = jax.nn.sigmoid(
        jnp.dot(h_ref.astype(jnp.bfloat16), w4_t.astype(jnp.bfloat16),
                preferred_element_type=jnp.float32) + b4
    )
    assert jnp.allclose(out, ref_bf16, atol=1e-5, rtol=1e-5)

    # Also exercise a batch that spans multiple grid steps / padding paths.
    z_big = jax.random.normal(kz, (1000, Z_DIM), jnp.float32)
    out_big = jax.block_until_ready(decoder_forward(z_big, w3_t, b3, w4_t, b4))
    ref_big = jax.nn.sigmoid(jnp.maximum(z_big @ w3_t + b3, 0.0) @ w4_t + b4)
    assert out_big.shape == (1000, X_DIM)
    assert jnp.allclose(out_big, ref_big, atol=1e-2, rtol=1e-2)

    print("KERNEL_OK")
</pallas_src>

<mosaic_0001>
module attributes {stable_mosaic.version = 11 : i64} {
  func.func @decoder_kernel(%arg0: i32, %arg1: memref<8x2xf32, #tpu.memory_space<vmem>>, %arg2: memref<2x512xf32, #tpu.memory_space<vmem>>, %arg3: memref<1x512xf32, #tpu.memory_space<vmem>>, %arg4: memref<512x896xbf16, #tpu.memory_space<vmem>>, %arg5: memref<1x896xf32, #tpu.memory_space<vmem>>, %arg6: memref<8x896xf32, #tpu.memory_space<vmem>>) attributes {dimension_semantics = [#tpu.dimension_semantics<parallel>], iteration_bounds = array<i64: 1>, scalar_prefetch = 0 : i64, scratch_operands = 0 : i64, tpu.core_type = #tpu.core_type<tc>, window_params = [{transform_indices = @transform_0, window_bounds = array<i64: 8, 2>}, {pipeline_mode = #tpu.pipeline_mode<synchronous>, transform_indices = @transform_1, window_bounds = array<i64: 2, 512>}, {pipeline_mode = #tpu.pipeline_mode<synchronous>, transform_indices = @transform_2, window_bounds = array<i64: 1, 512>}, {pipeline_mode = #tpu.pipeline_mode<synchronous>, transform_indices = @transform_3, window_bounds = array<i64: 512, 896>}, {pipeline_mode = #tpu.pipeline_mode<synchronous>, transform_indices = @transform_4, window_bounds = array<i64: 1, 896>}, {transform_indices = @transform_5, window_bounds = array<i64: 8, 896>}]} {
    %c0 = arith.constant 0 : index
    %c0_0 = arith.constant 0 : index
    %0 = vector.load %arg1[%c0, %c0_0] : memref<8x2xf32, #tpu.memory_space<vmem>>, vector<8x2xf32>
    %c0_1 = arith.constant 0 : index
    %c0_2 = arith.constant 0 : index
    %1 = vector.load %arg2[%c0_1, %c0_2] : memref<2x512xf32, #tpu.memory_space<vmem>>, vector<2x512xf32>
    %2 = vector.extract_strided_slice %0 {offsets = [0, 0], sizes = [8, 1], strides = [1, 1]} : vector<8x2xf32> to vector<8x1xf32>
    %3 = vector.extract_strided_slice %1 {offsets = [0, 0], sizes = [1, 512], strides = [1, 1]} : vector<2x512xf32> to vector<1x512xf32>
    %4 = vector.broadcast %2 : vector<8x1xf32> to vector<8x512xf32>
    %5 = vector.broadcast %3 : vector<1x512xf32> to vector<8x512xf32>
    %6 = arith.mulf %4, %5 : vector<8x512xf32>
    %7 = vector.extract_strided_slice %0 {offsets = [0, 1], sizes = [8, 1], strides = [1, 1]} : vector<8x2xf32> to vector<8x1xf32>
    %8 = vector.extract_strided_slice %1 {offsets = [1, 0], sizes = [1, 512], strides = [1, 1]} : vector<2x512xf32> to vector<1x512xf32>
    %9 = vector.broadcast %7 : vector<8x1xf32> to vector<8x512xf32>
    %10 = vector.broadcast %8 : vector<1x512xf32> to vector<8x512xf32>
    %11 = arith.mulf %9, %10 : vector<8x512xf32>
    %12 = arith.addf %6, %11 : vector<8x512xf32>
    %c0_3 = arith.constant 0 : index
    %c0_4 = arith.constant 0 : index
    %13 = vector.load %arg3[%c0_3, %c0_4] : memref<1x512xf32, #tpu.memory_space<vmem>>, vector<1x512xf32>
    %14 = vector.broadcast %13 : vector<1x512xf32> to vector<8x512xf32>
    %15 = arith.addf %12, %14 : vector<8x512xf32>
    %cst = arith.constant 0.000000e+00 : f32
    %16 = vector.broadcast %cst : f32 to vector<8x512xf32>
    %17 = arith.maximumf %15, %16 : vector<8x512xf32>
    %18 = arith.truncf %17 : vector<8x512xf32> to vector<8x512xbf16>
    %c0_5 = arith.constant 0 : index
    %c0_6 = arith.constant 0 : index
    %19 = vector.load %arg4[%c0_5, %c0_6] : memref<512x896xbf16, #tpu.memory_space<vmem>>, vector<512x896xbf16>
    %cst_7 = arith.constant dense<0.000000e+00> : vector<8x896xf32>
    %20 = tpu.matmul %18, %19, %cst_7 {dimension_numbers = #tpu.dot_dimension_numbers<[1], [0], [0], [1], [0, 0, 1, 1], [], []>} : vector<8x512xbf16>, vector<512x896xbf16>, vector<8x896xf32> -> vector<8x896xf32>
    %c0_8 = arith.constant 0 : index
    %c0_9 = arith.constant 0 : index
    %21 = vector.load %arg5[%c0_8, %c0_9] : memref<1x896xf32, #tpu.memory_space<vmem>>, vector<1x896xf32>
    %22 = vector.broadcast %21 : vector<1x896xf32> to vector<8x896xf32>
    %23 = arith.addf %20, %22 : vector<8x896xf32>
    %24 = arith.negf %23 : vector<8x896xf32>
    %25 = math.exp %24 : vector<8x896xf32>
    %cst_10 = arith.constant 1.000000e+00 : f32
    %26 = vector.broadcast %cst_10 : f32 to vector<8x896xf32>
    %27 = arith.addf %26, %25 : vector<8x896xf32>
    %28 = arith.divf %26, %27 : vector<8x896xf32>
    %c0_11 = arith.constant 0 : index
    %c0_12 = arith.constant 0 : index
    %29 = vector.load %arg6[%c0_11, %c0_12] : memref<8x896xf32, #tpu.memory_space<vmem>>, vector<8x896xf32>
    tpu.vector_store %arg6[%c0_11, %c0_12], %28 {strides = array<i32>} : memref<8x896xf32, #tpu.memory_space<vmem>>, vector<8x896xf32>,
    return
  }
  func.func @transform_0(%arg0: i32) -> (i32, i32) {
    %c0_i32 = arith.constant 0 : i32
    %c0_i32_0 = arith.constant 0 : i32
    return %arg0, %c0_i32 : i32, i32
  }
  func.func @transform_1(%arg0: i32) -> (i32, i32) {
    %c0_i32 = arith.constant 0 : i32
    %c0_i32_0 = arith.constant 0 : i32
    %c0_i32_1 = arith.constant 0 : i32
    return %c0_i32, %c0_i32_0 : i32, i32
  }
  func.func @transform_2(%arg0: i32) -> (i32, i32) {
    %c0_i32 = arith.constant 0 : i32
    %c0_i32_0 = arith.constant 0 : i32
    %c0_i32_1 = arith.constant 0 : i32
    return %c0_i32, %c0_i32_0 : i32, i32
  }
  func.func @transform_3(%arg0: i32) -> (i32, i32) {
    %c0_i32 = arith.constant 0 : i32
    %c0_i32_0 = arith.constant 0 : i32
    %c0_i32_1 = arith.constant 0 : i32
    return %c0_i32, %c0_i32_0 : i32, i32
  }
  func.func @transform_4(%arg0: i32) -> (i32, i32) {
    %c0_i32 = arith.constant 0 : i32
    %c0_i32_0 = arith.constant 0 : i32
    %c0_i32_1 = arith.constant 0 : i32
    return %c0_i32, %c0_i32_0 : i32, i32
  }
  func.func @transform_5(%arg0: i32) -> (i32, i32) {
    %c0_i32 = arith.constant 0 : i32
    %c0_i32_0 = arith.constant 0 : i32
    return %arg0, %c0_i32 : i32, i32
  }
}

</mosaic_0001>

<bundles_post_ra>
// kernel: tpu_custom_call.1
= control target key start
LH: loop header
LB: loop body
LE: loop exit
PB: predicated region body
PF: predicated region fallthrough
CT: control target
= control target key end

     0   :  { %10 = vsyncpa [#allocation3], 0  ;;  %s2911_s0 = inlined_call_operand.vmem [shape: f32[8,2], index: 0, kind: input, shape index: {}]   ;;  %s2912_s1 = inlined_call_operand.vmem [shape: f32[2,512], index: 1, kind: input, shape index: {}]   ;;  %s2913_s2 = inlined_call_operand.hbm [shape: f32[1,512], index: 2, kind: input, shape index: {}]   ;;  %s2914_s3 = inlined_call_operand.hbm [shape: bf16[512,896], index: 3, kind: input, shape index: {}]   ;;  %s2915_s4 = inlined_call_operand.vmem [shape: f32[1,896], index: 4, kind: input, shape index: {}]   ;;  %s2916_s5 = inlined_call_operand.hbm [shape: f32[8,896], index: 5, kind: output, shape index: {}]  }
   0x1   :  { %11 = vsyncpa [#allocation6], 0 }
   0x2   :  { %12 = vsyncpa [#allocation4], 0  ;;  %s2736_s18 = smov [#allocation2]   ;;  %s2737_s20 = smov [#allocation5]  }
   0x3   :  { %s23_s19 = sshll.u32 %s2736_s18, 4  ;;  %s32_s21 = sshll.u32 %s2737_s20, 4  ;;  %s24_s19 = int_to_ptr.vmem [resolvable:$true] %s23_s19  ;;  %s2773_s21 = int_to_ptr.vmem [resolvable:$true] %s32_s21 }
   0x4   :  { %s2664_s24 = scalar_lea.hbm %s2913_s2, 64 }
   0x5   :  { %p2665_p0 = scmp.ne.s32.totalorder %s2913_s2, %s2664_s24  ;;  %p2668_p1 = scmp.lt.u32.totalorder %s2664_s24, %s2913_s2 }
   0x7   :  { %p2670_p2 = pnand %p2668_p1, %p2665_p0 }
   0x9   :  { %2673 = shalt.err (!%p2670_p2)
}
   0xa   :  { %s2674_s29 = scalar_lea.vmem %s24_s19, 64  ;;  %p2679_p4 = scmp.lt.s32.totalorder %s24_s19, %s24_s19 }
   0xb   :  { %p2675_p3 = scmp.ne.s32.totalorder %s24_s19, %s2674_s29  ;;  %p2680_p5 = scmp.lt.s32.totalorder %s2674_s29, %s2674_s29 }
   0xd   :  { %p2681_p6 = por %p2680_p5, %p2679_p4 }
   0xf   :  { %p2682_p7 = pnand %p2681_p6, %p2675_p3 }
  0x11   :  { %2685 = shalt.err (!%p2682_p7)
}
  0x12   :  { %26 = dma.hbm_to_vmem [thread:$0]  %s2913_s2, 64, %s24_s19, [#allocation3]  }
  0x13   :  { %s2686_s9 = scalar_lea.hbm %s2914_s3, 28672 }
  0x14   :  { %p2687_p8 = scmp.ne.s32.totalorder %s2914_s3, %s2686_s9  ;;  %p2690_p9 = scmp.lt.u32.totalorder %s2686_s9, %s2914_s3 }
  0x16   :  { %p2692_p10 = pnand %p2690_p9, %p2687_p8 }
  0x18   :  { %2695 = shalt.err (!%p2692_p10)
}
  0x19   :  { %s2696_s14 = scalar_lea.vmem %s2773_s21, 28672  ;;  %p2701_p12 = scmp.lt.s32.totalorder %s2773_s21, %s2773_s21 }
  0x1a   :  { %p2697_p11 = scmp.ne.s32.totalorder %s2773_s21, %s2696_s14  ;;  %p2702_p13 = scmp.lt.s32.totalorder %s2696_s14, %s2696_s14 }
  0x1c   :  { %p2703_p0 = por %p2702_p13, %p2701_p12 }
  0x1e   :  { %p2704_p1 = pnand %p2703_p0, %p2697_p11 }
  0x20   :  { %2707 = shalt.err (!%p2704_p1)
}
  0x21   :  { %s2738_s2 = smov 448   ;;  %s2739_s15 = smov 28  }
  0x22   :  { %38 = dma.hbm_to_vmem [thread:$0]  %s2914_s3, 28672, %s2773_s21, [#allocation6], %s2738_s2, %s2738_s2, %s2739_s15  }
  0x23   :  { %2730 = dma.done.wait [#allocation3], 64  }
  0x24   :  { %2731 = vsyncadd [#allocation3], 4294967232 }
  0x25   :  { %2732 = dma.done.wait [#allocation6], 28672  }
  0x26   :  { %2733 = vsyncadd [#allocation6], 4294938624  ;;  %v2740_v0 = vmov 0   ;;  %v48_v1 = vld [vmem:[%s2911_s0] sm:$0xff]  ;;  %v2316_v2 = vld [vmem:[#allocation5 + $0x4] ss:$28 sps:$4 sm:$0xff]  }
  0x27   :  { %2314 = vset.pattern.permute.xlu0 %v2740_v0  ;;  %v2318_v3 = vld [vmem:[#allocation5 + $0xc] ss:$28 sps:$4 sm:$0xff]   ;;  %v2320_v4 = vld [vmem:[#allocation5] ss:$28 sps:$4 sm:$0xff]   ;;  %1623 = vmatprep.subr.bf16.mxu0 %v2316_v2  ;;  %v2741_v8 = vmov 1  }
  0x28   :  { %52 = vperm.xlu0 %2314, %v48_v1   ;;  %v2321_v5 = vld [vmem:[#allocation5 + $0x8] ss:$28 sps:$4 sm:$0xff]   ;;  %v2322_v6 = vld [vmem:[#allocation5 + $0x3c] ss:$28 sps:$4 sm:$0xff]   ;;  %1705 = vmatprep.subr.bf16.mxu1 %v2318_v3  ;;  %v2328_v11 = vld [vmem:[#allocation5 + $0x74] ss:$28 sps:$4 sm:$0xff]  }
  0x29   :  { %1624 = vmatpush1.bf16.msra.mxu0 %v2320_v4  ;;  %v2324_v7 = vld [vmem:[#allocation5 + $0x44] ss:$28 sps:$4 sm:$0xff]   ;;  %1706 = vmatpush1.bf16.msra.mxu1 %v2321_v5  ;;  %v2326_v9 = vld [vmem:[#allocation5 + $0x38] ss:$28 sps:$4 sm:$0xff]   ;;  %v2332_v13 = vld [vmem:[#allocation5 + $0x70] ss:$28 sps:$4 sm:$0xff]   ;;  %v56_v5 = vlaneseq }
  0x2a   :  { %v2327_v10 = vld [vmem:[#allocation5 + $0x40] ss:$28 sps:$4 sm:$0xff]   ;;  %1625 = vmatprep.subr.bf16.mxu0 %v2322_v6  ;;  %1707 = vmatprep.subr.bf16.mxu1 %v2324_v7  ;;  %v2333_v14 = vld [vmem:[#allocation5 + $0x78] ss:$28 sps:$4 sm:$0xff]   ;;  %v2334_v15 = vld [vmem:[#allocation5 + $0xac] ss:$28 sps:$4 sm:$0xff]  }
  0x2b   :  { %v2330_v12 = vld [vmem:[#allocation5 + $0x7c] ss:$28 sps:$4 sm:$0xff]   ;;  %v2336_v16 = vld [vmem:[#allocation5 + $0xb4] ss:$28 sps:$4 sm:$0xff]   ;;  %v2338_v17 = vld [vmem:[#allocation5 + $0xa8] ss:$28 sps:$4 sm:$0xff]  }
  0x2c   :  { %2315 = vset.pattern.permute.xlu0 %v2741_v8  ;;  %v2339_v18 = vld [vmem:[#allocation5 + $0xb0] ss:$28 sps:$4 sm:$0xff]   ;;  %v2340_v19 = vld [vmem:[#allocation5 + $0xe4] ss:$28 sps:$4 sm:$0xff]   ;;  %v2346_v23 = vld [vmem:[#allocation5 + $0x11c] ss:$28 sps:$4 sm:$0xff]  }
  0x2d   :  { %97 = vperm.xlu0 %2315, %v48_v1   ;;  %1626 = vmatpush1.bf16.msra.mxu0 %v2326_v9  ;;  %v2342_v20 = vld [vmem:[#allocation5 + $0xec] ss:$28 sps:$4 sm:$0xff]   ;;  %v2344_v21 = vld [vmem:[#allocation5 + $0xe0] ss:$28 sps:$4 sm:$0xff]   ;;  %v2350_v25 = vld [vmem:[#allocation5 + $0x118] ss:$28 sps:$4 sm:$0xff]  }
  0x2e   :  { %1708 = vmatpush1.bf16.msra.mxu1 %v2327_v10  ;;  %1627 = vmatprep.subr.bf16.mxu0 %v2328_v11  ;;  %v2345_v22 = vld [vmem:[#allocation5 + $0xe8] ss:$28 sps:$4 sm:$0xff]   ;;  %v2351_v26 = vld [vmem:[#allocation5 + $0x120] ss:$28 sps:$4 sm:$0xff]   ;;  %v2352_v27 = vld [vmem:[#allocation5 + $0x154] ss:$28 sps:$4 sm:$0xff]  }
  0x2f   :  { %1709 = vmatprep.subr.bf16.mxu1 %v2330_v12  ;;  %v2348_v24 = vld [vmem:[#allocation5 + $0x124] ss:$28 sps:$4 sm:$0xff]   ;;  %v2354_v28 = vld [vmem:[#allocation5 + $0x15c] ss:$28 sps:$4 sm:$0xff]   ;;  %v2356_v29 = vld [vmem:[#allocation5 + $0x150] ss:$28 sps:$4 sm:$0xff]  }
  0x30   :  { %v2357_v30 = vld [vmem:[#allocation5 + $0x158] ss:$28 sps:$4 sm:$0xff]   ;;  %v2358_v31 = vld [vmem:[#allocation5 + $0x18c] ss:$28 sps:$4 sm:$0xff]   ;;  %v2364_v35 = vld [vmem:[#allocation5 + $0x1c4] ss:$28 sps:$4 sm:$0xff]  }
  0x31   :  { %1628 = vmatpush1.bf16.msra.mxu0 %v2332_v13  ;;  %v2360_v32 = vld [vmem:[#allocation5 + $0x194] ss:$28 sps:$4 sm:$0xff]   ;;  %v2362_v33 = vld [vmem:[#allocation5 + $0x188] ss:$28 sps:$4 sm:$0xff]   ;;  %v2368_v37 = vld [vmem:[#allocation5 + $0x1c0] ss:$28 sps:$4 sm:$0xff]  }
  0x32   :  { %1710 = vmatpush1.bf16.msra.mxu1 %v2333_v14  ;;  %1629 = vmatprep.subr.bf16.mxu0 %v2334_v15  ;;  %v2363_v34 = vld [vmem:[#allocation5 + $0x190] ss:$28 sps:$4 sm:$0xff]   ;;  %v2369_v38 = vld [vmem:[#allocation5 + $0x1c8] ss:$28 sps:$4 sm:$0xff]   ;;  %v2370_v39 = vld [vmem:[#allocation5 + $0x1fc] ss:$28 sps:$4 sm:$0xff]  }
  0x33   :  { %1711 = vmatprep.subr.bf16.mxu1 %v2336_v16  ;;  %v2366_v36 = vld [vmem:[#allocation5 + $0x1cc] ss:$28 sps:$4 sm:$0xff]   ;;  %v2372_v40 = vld [vmem:[#allocation5 + $0x204] ss:$28 sps:$4 sm:$0xff]   ;;  %v2374_v41 = vld [vmem:[#allocation5 + $0x1f8] ss:$28 sps:$4 sm:$0xff]  }
  0x34   :  { %v2375_v42 = vld [vmem:[#allocation5 + $0x200] ss:$28 sps:$4 sm:$0xff]   ;;  %v2376_v43 = vld [vmem:[#allocation5 + $0x234] ss:$28 sps:$4 sm:$0xff]   ;;  %v2382_v47 = vld [vmem:[#allocation5 + $0x26c] ss:$28 sps:$4 sm:$0xff]  }
  0x35   :  { %1630 = vmatpush1.bf16.msra.mxu0 %v2338_v17  ;;  %v2378_v44 = vld [vmem:[#allocation5 + $0x23c] ss:$28 sps:$4 sm:$0xff]   ;;  %v2380_v45 = vld [vmem:[#allocation5 + $0x230] ss:$28 sps:$4 sm:$0xff]   ;;  %v2386_v49 = vld [vmem:[#allocation5 + $0x268] ss:$28 sps:$4 sm:$0xff]  }
  0x36   :  { %1712 = vmatpush1.bf16.msra.mxu1 %v2339_v18  ;;  %1631 = vmatprep.subr.bf16.mxu0 %v2340_v19  ;;  %v2381_v46 = vld [vmem:[#allocation5 + $0x238] ss:$28 sps:$4 sm:$0xff]   ;;  %v2387_v50 = vld [vmem:[#allocation5 + $0x270] ss:$28 sps:$4 sm:$0xff]   ;;  %v2388_v51 = vld [vmem:[#allocation5 + $0x2a4] ss:$28 sps:$4 sm:$0xff]  }
  0x37   :  { %1713 = vmatprep.subr.bf16.mxu1 %v2342_v20  ;;  %v2384_v48 = vld [vmem:[#allocation5 + $0x274] ss:$28 sps:$4 sm:$0xff]   ;;  %v2390_v52 = vld [vmem:[#allocation5 + $0x2ac] ss:$28 sps:$4 sm:$0xff]   ;;  %v2392_v53 = vld [vmem:[#allocation5 + $0x2a0] ss:$28 sps:$4 sm:$0xff]  }
  0x38   :  { %v2393_v54 = vld [vmem:[#allocation5 + $0x2a8] ss:$28 sps:$4 sm:$0xff]   ;;  %v2394_v55 = vld [vmem:[#allocation5 + $0x2dc] ss:$28 sps:$4 sm:$0xff]   ;;  %v2400_v59 = vld [vmem:[#allocation5 + $0x314] ss:$28 sps:$4 sm:$0xff]  }
  0x39   :  { %1632 = vmatpush1.bf16.msra.mxu0 %v2344_v21  ;;  %v2396_v56 = vld [vmem:[#allocation5 + $0x2e4] ss:$28 sps:$4 sm:$0xff]   ;;  %v2398_v57 = vld [vmem:[#allocation5 + $0x2d8] ss:$28 sps:$4 sm:$0xff]   ;;  %v2404_v61 = vld [vmem:[#allocation5 + $0x310] ss:$28 sps:$4 sm:$0xff]  }
  0x3a   :  { %1714 = vmatpush1.bf16.msra.mxu1 %v2345_v22  ;;  %1633 = vmatprep.subr.bf16.mxu0 %v2346_v23  ;;  %v2399_v58 = vld [vmem:[#allocation5 + $0x2e0] ss:$28 sps:$4 sm:$0xff]   ;;  %v2405_v62 = vld [vmem:[#allocation5 + $0x318] ss:$28 sps:$4 sm:$0xff]   ;;  %v2406_v63 = vld [vmem:[#allocation5 + $0x34c] ss:$28 sps:$4 sm:$0xff]  }
  0x3b   :  { %1715 = vmatprep.subr.bf16.mxu1 %v2348_v24  ;;  %v2402_v60 = vld [vmem:[#allocation5 + $0x31c] ss:$28 sps:$4 sm:$0xff]   ;;  %v2408_v0 = vld [vmem:[#allocation5 + $0x354] ss:$28 sps:$4 sm:$0xff]   ;;  %v2410_v1 = vld [vmem:[#allocation5 + $0x348] ss:$28 sps:$4 sm:$0xff]  }
  0x3c   :  { %v2411_v2 = vld [vmem:[#allocation5 + $0x350] ss:$28 sps:$4 sm:$0xff]   ;;  %v2414_v3 = vld [vmem:[#allocation5 + $0x384] ss:$28 sps:$4 sm:$0xff]   ;;  %v2807_v6 = vshrl.u32 %v56_v5, 7 }
  0x3d   :  { %1634 = vmatpush1.bf16.msra.mxu0 %v2350_v25  ;;  %v2417_v4 = vld [vmem:[#allocation5 + $0x38c] ss:$28 sps:$4 sm:$0xff]  }
  0x3e   :  { %1716 = vmatpush1.bf16.msra.mxu1 %v2351_v26  ;;  %1635 = vmatprep.subr.bf16.mxu0 %v2352_v27  ;;  %v66_v7 = vsub.s32 4, %v2807_v6  ;;  %v49_v8 = vld [vmem:[%s2912_s1] sm:$0xff]  ;;  %v2814_v9 = vsub.s32 0, %v2807_v6  ;;  %v2817_v10 = vsub.s32 2, %v2807_v6  ;;  %v70_v11 = vsub.s32 6, %v2807_v6 }
  0x3f   :  { %1717 = vmatprep.subr.bf16.mxu1 %v2354_v28  ;;  %v2823_v13 = vsub.s32 1, %v2807_v6  ;;  %v2826_v14 = vsub.s32 3, %v2807_v6  ;;  %v110_v15 = vsub.s32 5, %v2807_v6  ;;  %v114_v16 = vsub.s32 7, %v2807_v6  ;;  %v2424_v5 = vld [vmem:[#allocation5 + $0x3f0] ss:$28 sps:$4 sm:$0xff]  }
  0x40   :  { %v67_v12 = vrot.slane %v49_v8, %v66_v7  ;;  %v59_v17 = vrot.slane %v49_v8, %v2814_v9  ;;  %v63_v18 = vrot.slane %v49_v8, %v2817_v10  ;;  %v71_v19 = vrot.slane %v49_v8, %v70_v11 }
  0x41   :  { %1636 = vmatpush1.bf16.msra.mxu0 %v2356_v29  ;;  %v103_v21 = vrot.slane %v49_v8, %v2823_v13  ;;  %v107_v22 = vrot.slane %v49_v8, %v2826_v14  ;;  %v111_v23 = vrot.slane %v49_v8, %v110_v15  ;;  %v115_v24 = vrot.slane %v49_v8, %v114_v16  ;;  %v2427_v8 = vld [vmem:[#allocation5 + $0x3f8] ss:$28 sps:$4 sm:$0xff]  }
  0x42   :  { %1718 = vmatpush1.bf16.msra.mxu1 %v2357_v30  ;;  %1637 = vmatprep.subr.bf16.mxu0 %v2358_v31  ;;  %v87_v20 = vrot.slane %v67_v12, %v2814_v9  ;;  %v79_v26 = vrot.slane %v59_v17, %v2814_v9  ;;  %v83_v27 = vrot.slane %v63_v18, %v2814_v9  ;;  %v144_v30 = vld [vmem:[#allocation2] sm:$0xf]  ;;  %v2432_v12 = vld [vmem:[#allocation5 + $0x42c] ss:$28 sps:$4 sm:$0xff]   ;;  %v2435_v16 = vld [vmem:[#allocation5 + $0x434] ss:$28 sps:$4 sm:$0xff]  }
  0x43   :  { %1719 = vmatprep.subr.bf16.mxu1 %v2360_v32  ;;  %v91_v28 = vrot.slane %v71_v19, %v2814_v9  ;;  %v123_v31 = vrot.slane %v103_v21, %v2823_v13  ;;  %v127_v32 = vrot.slane %v107_v22, %v2823_v13  ;;  %v2430_v17 = vld [vmem:[#allocation5 + $0x428] ss:$28 sps:$4 sm:$0xff]   ;;  %v2433_v18 = vld [vmem:[#allocation5 + $0x430] ss:$28 sps:$4 sm:$0xff]   ;;  %v2436_v21 = vld [vmem:[#allocation5 + $0x460] ss:$28 sps:$4 sm:$0xff]  }
  0x44   :  { %v2438_v19 = vld [vmem:[#allocation5 + $0x464] ss:$28 sps:$4 sm:$0xff]  }
  0x45   :  { %1638 = vmatpush1.bf16.msra.mxu0 %v2362_v33  ;;  %v131_v33 = vrot.slane %v111_v23, %v2823_v13  ;;  %v2439_v22 = vld [vmem:[#allocation5 + $0x468] ss:$28 sps:$4 sm:$0xff]   ;;  %v2444_v23 = vld [vmem:[#allocation5 + $0x49c] ss:$28 sps:$4 sm:$0xff]  }
  0x46   :  { %1720 = vmatpush1.bf16.msra.mxu1 %v2363_v34  ;;  %1639 = vmatprep.subr.bf16.mxu0 %v2364_v35  ;;  %v135_v34 = vrot.slane %v115_v24, %v2823_v13  ;;  %v149_v35 = vrot.slane %v144_v30, %v2814_v9  ;;  %v2447_v24 = vld [vmem:[#allocation5 + $0x4a4] ss:$28 sps:$4 sm:$0xff]  }
  0x47   :  { %1721 = vmatprep.subr.bf16.mxu1 %v2366_v36  ;;  %v153_v36 = vrot.slane %v144_v30, %v2823_v13 }
  0x49   :  { %1640 = vmatpush1.bf16.msra.mxu0 %v2368_v37  ;;  %v157_v37 = vrot.slane %v144_v30, %v2817_v10 }
  0x4a   :  { %1722 = vmatpush1.bf16.msra.mxu1 %v2369_v38  ;;  %1641 = vmatprep.subr.bf16.mxu0 %v2370_v39 }
  0x4b   :  { %1723 = vmatprep.subr.bf16.mxu1 %v2372_v40 }
  0x4d   :  { %1642 = vmatpush1.bf16.msra.mxu0 %v2374_v41  ;;  %v161_v41 = vrot.slane %v144_v30, %v2826_v14  ;;  %v2451_v30 = vld [vmem:[#allocation5 + $0x4d8] ss:$28 sps:$4 sm:$0xff]  }
  0x4e   :  { %1724 = vmatpush1.bf16.msra.mxu1 %v2375_v42  ;;  %1643 = vmatprep.subr.bf16.mxu0 %v2376_v43 }
  0x4f   :  { %1725 = vmatprep.subr.bf16.mxu1 %v2378_v44 }
  0x51   :  { %1644 = vmatpush1.bf16.msra.mxu0 %v2380_v45 }
  0x52   :  { %1726 = vmatpush1.bf16.msra.mxu1 %v2381_v46  ;;  %1645 = vmatprep.subr.bf16.mxu0 %v2382_v47 }
  0x53   :  { %1727 = vmatprep.subr.bf16.mxu1 %v2384_v48 }
  0x55   :  { %1646 = vmatpush1.bf16.msra.mxu0 %v2386_v49 }
  0x56   :  { %1728 = vmatpush1.bf16.msra.mxu1 %v2387_v50  ;;  %1647 = vmatprep.subr.bf16.mxu0 %v2388_v51 }
  0x57   :  { %1729 = vmatprep.subr.bf16.mxu1 %v2390_v52 }
  0x59   :  { %1648 = vmatpush1.bf16.msra.mxu0 %v2392_v53 }
  0x5a   :  { %1730 = vmatpush1.bf16.msra.mxu1 %v2393_v54  ;;  %1649 = vmatprep.subr.bf16.mxu0 %v2394_v55 }
  0x5b   :  { %1731 = vmatprep.subr.bf16.mxu1 %v2396_v56  ;;  %v2412_v56 = vld [vmem:[#allocation5 + $0x380] ss:$28 sps:$4 sm:$0xff]  }
  0x5d   :  { %1650 = vmatpush1.bf16.msra.mxu0 %v2398_v57 }
  0x5e   :  { %1732 = vmatpush1.bf16.msra.mxu1 %v2399_v58  ;;  %1651 = vmatprep.subr.bf16.mxu0 %v2400_v59  ;;  %v2415_v58 = vld [vmem:[#allocation5 + $0x388] ss:$28 sps:$4 sm:$0xff]  }
  0x5f   :  { %1733 = vmatprep.subr.bf16.mxu1 %v2402_v60 }
  0x61   :  { %1652 = vmatpush1.bf16.msra.mxu0 %v2404_v61 }
  0x62   :  { %1734 = vmatpush1.bf16.msra.mxu1 %v2405_v62  ;;  %1653 = vmatprep.subr.bf16.mxu0 %v2406_v63  ;;  %v2420_v62 = vld [vmem:[#allocation5 + $0x3bc] ss:$28 sps:$4 sm:$0xff]  }
  0x63   :  { %1735 = vmatprep.subr.bf16.mxu1 %v2408_v0  ;;  %v2418_v63 = vld [vmem:[#allocation5 + $0x3b8] ss:$28 sps:$4 sm:$0xff]   ;;  %v2423_v0 = vld [vmem:[#allocation5 + $0x3c4] ss:$28 sps:$4 sm:$0xff]  }
  0x65   :  { %1654 = vmatpush1.bf16.msra.mxu0 %v2410_v1 }
  0x66   :  { %1736 = vmatpush1.bf16.msra.mxu1 %v2411_v2  ;;  %1664 = vmatprep.subr.bf16.mxu0 %v2414_v3  ;;  %v2421_v2 = vld [vmem:[#allocation5 + $0x3c0] ss:$28 sps:$4 sm:$0xff]   ;;  %v2426_v3 = vld [vmem:[#allocation5 + $0x3f4] ss:$28 sps:$4 sm:$0xff]  }
  0x67   :  { %1746 = vmatprep.subr.bf16.mxu1 %v2417_v4  ;;  %v2429_v4 = vld [vmem:[#allocation5 + $0x3fc] ss:$28 sps:$4 sm:$0xff]  }
  0xa7   :  { %v53_v25 = vpop.permute.xlu0 %52 }
  0xa8   :  { %v94_v29 = vmul.f32 %v87_v20, %v53_v25  ;;  %v92_v38 = vmul.f32 %v79_v26, %v53_v25  ;;  %v93_v39 = vmul.f32 %v83_v27, %v53_v25  ;;  %v95_v40 = vmul.f32 %v91_v28, %v53_v25  ;;  %v2441_v20 = vld [vmem:[#allocation5 + $0x46c] ss:$28 sps:$4 sm:$0xff]   ;;  %v2442_v25 = vld [vmem:[#allocation5 + $0x498] ss:$28 sps:$4 sm:$0xff]   ;;  %v2445_v26 = vld [vmem:[#allocation5 + $0x4a0] ss:$28 sps:$4 sm:$0xff]  }
  0xa9   :  { %v2450_v27 = vld [vmem:[#allocation5 + $0x4d4] ss:$28 sps:$4 sm:$0xff]   ;;  %v2453_v28 = vld [vmem:[#allocation5 + $0x4dc] ss:$28 sps:$4 sm:$0xff]  }
  0xac   :  { %v98_v42 = vpop.permute.xlu0 %97 }
  0xad   :  { %v136_v43 = vmul.f32 %v123_v31, %v98_v42  ;;  %v137_v44 = vmul.f32 %v127_v32, %v98_v42  ;;  %v138_v45 = vmul.f32 %v131_v33, %v98_v42  ;;  %v139_v46 = vmul.f32 %v135_v34, %v98_v42  ;;  %v2456_v31 = vld [vmem:[#allocation5 + $0x50c] ss:$28 sps:$4 sm:$0xff]   ;;  %v2459_v32 = vld [vmem:[#allocation5 + $0x514] ss:$28 sps:$4 sm:$0xff]   ;;  %v2469_v42 = vld [vmem:[#allocation5 + $0x580] ss:$28 sps:$4 sm:$0xff]  }
  0xae   :  { %v2454_v33 = vld [vmem:[#allocation5 + $0x508] ss:$28 sps:$4 sm:$0xff]   ;;  %v2457_v34 = vld [vmem:[#allocation5 + $0x510] ss:$28 sps:$4 sm:$0xff]  }
  0xaf   :  { %v140_v47 = vadd.f32 %v136_v43, %v92_v38  ;;  %v141_v48 = vadd.f32 %v137_v44, %v93_v39  ;;  %v142_v49 = vadd.f32 %v138_v45, %v94_v29  ;;  %v143_v50 = vadd.f32 %v139_v46, %v95_v40  ;;  %v2448_v29 = vld [vmem:[#allocation5 + $0x4d0] ss:$28 sps:$4 sm:$0xff]   ;;  %v2463_v38 = vld [vmem:[#allocation5 + $0x548] ss:$28 sps:$4 sm:$0xff]   ;;  %v2468_v39 = vld [vmem:[#allocation5 + $0x57c] ss:$28 sps:$4 sm:$0xff]  }
  0xb0   :  { %v2471_v40 = vld [vmem:[#allocation5 + $0x584] ss:$28 sps:$4 sm:$0xff]   ;;  %v2474_v43 = vld [vmem:[#allocation5 + $0x5b4] ss:$28 sps:$4 sm:$0xff]   ;;  %v2477_v44 = vld [vmem:[#allocation5 + $0x5bc] ss:$28 sps:$4 sm:$0xff]  }
  0xb1   :  { %v166_v51 = vadd.f32 %v149_v35, %v140_v47  ;;  %v167_v52 = vadd.f32 %v153_v36, %v141_v48  ;;  %v2850_v53 = vadd.f32 %v157_v37, %v142_v49  ;;  %v169_v54 = vadd.f32 %v161_v41, %v143_v50  ;;  %v2462_v35 = vld [vmem:[#allocation5 + $0x544] ss:$28 sps:$4 sm:$0xff]   ;;  %v2465_v36 = vld [vmem:[#allocation5 + $0x54c] ss:$28 sps:$4 sm:$0xff]   ;;  %v2466_v41 = vld [vmem:[#allocation5 + $0x578] ss:$28 sps:$4 sm:$0xff]  }
  0xb2   :  { %v2460_v37 = vld [vmem:[#allocation5 + $0x540] ss:$28 sps:$4 sm:$0xff]   ;;  %v2472_v45 = vld [vmem:[#allocation5 + $0x5b0] ss:$28 sps:$4 sm:$0xff]   ;;  %v2475_v46 = vld [vmem:[#allocation5 + $0x5b8] ss:$28 sps:$4 sm:$0xff]  }
  0xb3   :  { %v171_v55 = vmax.f32 %v167_v52, 0.0  ;;  %v170_v57 = vmax.f32 %v166_v51, 0.0  ;;  %v173_v59 = vmax.f32 %v169_v54, 0.0  ;;  %v2480_v47 = vld [vmem:[#allocation5 + $0x5ec] ss:$28 sps:$4 sm:$0xff]  }
  0xb4   :  { %v2483_v48 = vld [vmem:[#allocation5 + $0x5f4] ss:$28 sps:$4 sm:$0xff]   ;;  %v2478_v49 = vld [vmem:[#allocation5 + $0x5e8] ss:$28 sps:$4 sm:$0xff]   ;;  %v2484_v54 = vld [vmem:[#allocation5 + $0x620] ss:$28 sps:$4 sm:$0xff]  }
  0xb5   :  { %v2852_v60 = vpack.c.bf16 %v171_v55, %v171_v55  ;;  %v2854_v61 = vpack.c.bf16 %v170_v57, %v170_v57  ;;  %v2860_v1 = vpack.c.bf16 %v173_v59, %v173_v59  ;;  %v2481_v50 = vld [vmem:[#allocation5 + $0x5f0] ss:$28 sps:$4 sm:$0xff]   ;;  %v2486_v51 = vld [vmem:[#allocation5 + $0x624] ss:$28 sps:$4 sm:$0xff]  }
  0xb6   :  { %v2489_v52 = vld [vmem:[#allocation5 + $0x62c] ss:$28 sps:$4 sm:$0xff]   ;;  %v2495_v57 = vld [vmem:[#allocation5 + $0x664] ss:$28 sps:$4 sm:$0xff]  }
  0xb7   :  { %1655 = vmatprep.mubr.bf16.mxu0 %v2852_v60  ;;  %1737 = vmatprep.mubr.bf16.mxu1 %v2852_v60  ;;  %v2487_v55 = vld [vmem:[#allocation5 + $0x628] ss:$28 sps:$4 sm:$0xff]   ;;  %v2493_v59 = vld [vmem:[#allocation5 + $0x660] ss:$28 sps:$4 sm:$0xff]  }
  0xb8   :  { %1656 = vmatmul.mubr.bf16.vlgmr.msra.gmra.mrb[0].mxu0 %v2854_v61  ;;  %1738 = vmatmul.mubr.bf16.vlgmr.msra.gmra.mrb[0].mxu1 %v2854_v61 }
  0xb9   :  { %1665 = vmatpush1.bf16.msra.mxu0 %v2412_v56  ;;  %1747 = vmatpush1.bf16.msra.mxu1 %v2415_v58  ;;  %v2492_v56 = vld [vmem:[#allocation5 + $0x65c] ss:$28 sps:$4 sm:$0xff]  }
  0xba   :  { %1696 = vmatprep.mubr.bf16.mxu0 %v2860_v1  ;;  %1778 = vmatprep.mubr.bf16.mxu1 %v2860_v1  ;;  %v2490_v58 = vld [vmem:[#allocation5 + $0x658] ss:$28 sps:$4 sm:$0xff]  }
  0xbb   :  { %1666 = vmatprep.subr.bf16.mxu0 %v2420_v62  ;;  %1748 = vmatprep.subr.bf16.mxu1 %v2423_v0  ;;  %v2498_v62 = vld [vmem:[#allocation5 + $0x694] ss:$28 sps:$4 sm:$0xff]  }
  0xbc   :  { %v2496_v0 = vld [vmem:[#allocation5 + $0x690] ss:$28 sps:$4 sm:$0xff]  }
  0xbd   :  { %1667 = vmatpush1.bf16.msra.mxu0 %v2418_v63  ;;  %1749 = vmatpush1.bf16.msra.mxu1 %v2421_v2  ;;  %v2501_v63 = vld [vmem:[#allocation5 + $0x69c] ss:$28 sps:$4 sm:$0xff]  }
  0xbe   :  { %1668 = vmatprep.subr.bf16.mxu0 %v2426_v3  ;;  %1750 = vmatprep.subr.bf16.mxu1 %v2429_v4  ;;  %v2499_v2 = vld [vmem:[#allocation5 + $0x698] ss:$28 sps:$4 sm:$0xff]   ;;  %v2504_v3 = vld [vmem:[#allocation5 + $0x6cc] ss:$28 sps:$4 sm:$0xff]  }
  0xbf   :  { %v2507_v4 = vld [vmem:[#allocation5 + $0x6d4] ss:$28 sps:$4 sm:$0xff]  }
  0xc1   :  { %1669 = vmatpush1.bf16.msra.mxu0 %v2424_v5  ;;  %1751 = vmatpush1.bf16.msra.mxu1 %v2427_v8  ;;  %v2502_v5 = vld [vmem:[#allocation5 + $0x6c8] ss:$28 sps:$4 sm:$0xff]   ;;  %v2505_v8 = vld [vmem:[#allocation5 + $0x6d0] ss:$28 sps:$4 sm:$0xff]  }
  0xc2   :  { %1670 = vmatprep.subr.bf16.mxu0 %v2432_v12  ;;  %1752 = vmatprep.subr.bf16.mxu1 %v2435_v16  ;;  %v172_v12 = vmax.f32 %v2850_v53, 0.0  ;;  %v2510_v16 = vld [vmem:[#allocation5 + $0x14] ss:$28 sps:$4 sm:$0xff]   ;;  %v2513_v53 = vld [vmem:[#allocation5 + $0x48] ss:$28 sps:$4 sm:$0xff]  }
  0xc5   :  { %1671 = vmatpush1.bf16.msra.mxu0 %v2430_v17  ;;  %1753 = vmatpush1.bf16.msra.mxu1 %v2433_v18  ;;  %v2511_v17 = vld [vmem:[#allocation5 + $0x1d8] ss:$28 sps:$4 sm:$0xff]   ;;  %v2508_v18 = vld [vmem:[#allocation5 + $0x10] ss:$28 sps:$4 sm:$0xff]  }
  0xc6   :  { %1672 = vmatprep.subr.bf16.mxu0 %v2438_v19  ;;  %1754 = vmatprep.subr.bf16.mxu1 %v2441_v20  ;;  %v2865_v19 = vpack.c.bf16 %v172_v12, %v172_v12  ;;  %v2512_v20 = vld [vmem:[#allocation5 + $0x18] ss:$28 sps:$4 sm:$0xff]   ;;  %v2575_v12 = vld [vmem:[#allocation5 + $0x2ec] ss:$28 sps:$4 sm:$0xff]  }
  0xc9   :  { %1673 = vmatpush1.bf16.msra.mxu0 %v2436_v21  ;;  %1755 = vmatpush1.bf16.msra.mxu1 %v2439_v22  ;;  %v2515_v21 = vld [vmem:[#allocation5 + $0x4c] ss:$28 sps:$4 sm:$0xff]  }
  0xca   :  { %1674 = vmatprep.subr.bf16.mxu0 %v2444_v23  ;;  %1756 = vmatprep.subr.bf16.mxu1 %v2447_v24  ;;  %v2516_v22 = vld [vmem:[#allocation5 + $0x210] ss:$28 sps:$4 sm:$0xff]   ;;  %v2520_v24 = vld [vmem:[#allocation5 + $0x84] ss:$28 sps:$4 sm:$0xff]  }
  0xcb   :  { %v2517_v23 = vld [vmem:[#allocation5 + $0x50] ss:$28 sps:$4 sm:$0xff]  }
  0xcd   :  { %1675 = vmatpush1.bf16.msra.mxu0 %v2442_v25  ;;  %1757 = vmatpush1.bf16.msra.mxu1 %v2445_v26  ;;  %v2521_v25 = vld [vmem:[#allocation5 + $0x248] ss:$28 sps:$4 sm:$0xff]   ;;  %v2518_v26 = vld [vmem:[#allocation5 + $0x80] ss:$28 sps:$4 sm:$0xff]  }
  0xce   :  { %1676 = vmatprep.subr.bf16.mxu0 %v2450_v27  ;;  %1758 = vmatprep.subr.bf16.mxu1 %v2453_v28  ;;  %v2522_v27 = vld [vmem:[#allocation5 + $0x88] ss:$28 sps:$4 sm:$0xff]   ;;  %v2525_v28 = vld [vmem:[#allocation5 + $0xbc] ss:$28 sps:$4 sm:$0xff]  }
  0xd1   :  { %1677 = vmatpush1.bf16.msra.mxu0 %v2448_v29  ;;  %1759 = vmatpush1.bf16.msra.mxu1 %v2451_v30  ;;  %v2526_v29 = vld [vmem:[#allocation5 + $0x280] ss:$28 sps:$4 sm:$0xff]   ;;  %v2523_v30 = vld [vmem:[#allocation5 + $0xb8] ss:$28 sps:$4 sm:$0xff]  }
  0xd2   :  { %1678 = vmatprep.subr.bf16.mxu0 %v2456_v31  ;;  %1760 = vmatprep.subr.bf16.mxu1 %v2459_v32  ;;  %v2527_v31 = vld [vmem:[#allocation5 + $0xc0] ss:$28 sps:$4 sm:$0xff]   ;;  %v2530_v32 = vld [vmem:[#allocation5 + $0xf4] ss:$28 sps:$4 sm:$0xff]  }
  0xd5   :  { %1679 = vmatpush1.bf16.msra.mxu0 %v2454_v33  ;;  %1761 = vmatpush1.bf16.msra.mxu1 %v2457_v34  ;;  %v2528_v33 = vld [vmem:[#allocation5 + $0xf0] ss:$28 sps:$4 sm:$0xff]   ;;  %v2532_v34 = vld [vmem:[#allocation5 + $0xf8] ss:$28 sps:$4 sm:$0xff]  }
  0xd6   :  { %1680 = vmatprep.subr.bf16.mxu0 %v2462_v35  ;;  %1762 = vmatprep.subr.bf16.mxu1 %v2465_v36  ;;  %v2535_v35 = vld [vmem:[#allocation5 + $0x12c] ss:$28 sps:$4 sm:$0xff]  }
  0xd7   :  { %v2536_v36 = vld [vmem:[#allocation5 + $0x2f0] ss:$28 sps:$4 sm:$0xff]  }
  0xd9   :  { %1681 = vmatpush1.bf16.msra.mxu0 %v2460_v37  ;;  %1763 = vmatpush1.bf16.msra.mxu1 %v2463_v38  ;;  %v2533_v37 = vld [vmem:[#allocation5 + $0x128] ss:$28 sps:$4 sm:$0xff]   ;;  %v2537_v38 = vld [vmem:[#allocation5 + $0x130] ss:$28 sps:$4 sm:$0xff]  }
  0xda   :  { %1682 = vmatprep.subr.bf16.mxu0 %v2468_v39  ;;  %1764 = vmatprep.subr.bf16.mxu1 %v2471_v40  ;;  %v2540_v39 = vld [vmem:[#allocation5 + $0x164] ss:$28 sps:$4 sm:$0xff]  }
  0xdb   :  { %v2541_v40 = vld [vmem:[#allocation5 + $0x328] ss:$28 sps:$4 sm:$0xff]  }
  0xdd   :  { %1683 = vmatpush1.bf16.msra.mxu0 %v2466_v41  ;;  %1765 = vmatpush1.bf16.msra.mxu1 %v2469_v42  ;;  %v2538_v41 = vld [vmem:[#allocation5 + $0x160] ss:$28 sps:$4 sm:$0xff]   ;;  %v2542_v42 = vld [vmem:[#allocation5 + $0x168] ss:$28 sps:$4 sm:$0xff]  }
  0xde   :  { %1684 = vmatprep.subr.bf16.mxu0 %v2474_v43  ;;  %1766 = vmatprep.subr.bf16.mxu1 %v2477_v44  ;;  %v2545_v43 = vld [vmem:[#allocation5 + $0x19c] ss:$28 sps:$4 sm:$0xff]  }
  0xdf   :  { %v2546_v44 = vld [vmem:[#allocation5 + $0x360] ss:$28 sps:$4 sm:$0xff]  }
  0xe1   :  { %1685 = vmatpush1.bf16.msra.mxu0 %v2472_v45  ;;  %1767 = vmatpush1.bf16.msra.mxu1 %v2475_v46  ;;  %v2543_v45 = vld [vmem:[#allocation5 + $0x198] ss:$28 sps:$4 sm:$0xff]   ;;  %v2547_v46 = vld [vmem:[#allocation5 + $0x1a0] ss:$28 sps:$4 sm:$0xff]  }
  0xe2   :  { %1686 = vmatprep.subr.bf16.mxu0 %v2480_v47  ;;  %1768 = vmatprep.subr.bf16.mxu1 %v2483_v48  ;;  %v2550_v47 = vld [vmem:[#allocation5 + $0x1d4] ss:$28 sps:$4 sm:$0xff]  }
  0xe3   :  { %v2551_v48 = vld [vmem:[#allocation5 + $0x558] ss:$28 sps:$4 sm:$0xff]  }
  0xe5   :  { %1687 = vmatpush1.bf16.msra.mxu0 %v2478_v49  ;;  %1769 = vmatpush1.bf16.msra.mxu1 %v2481_v50  ;;  %v2548_v49 = vld [vmem:[#allocation5 + $0x1d0] ss:$28 sps:$4 sm:$0xff]   ;;  %v2552_v50 = vld [vmem:[#allocation5 + $0x398] ss:$28 sps:$4 sm:$0xff]  }
  0xe6   :  { %1688 = vmatprep.subr.bf16.mxu0 %v2486_v51  ;;  %1770 = vmatprep.subr.bf16.mxu1 %v2489_v52  ;;  %v2555_v51 = vld [vmem:[#allocation5 + $0x20c] ss:$28 sps:$4 sm:$0xff]  }
  0xe7   :  { %v2556_v52 = vld [vmem:[#allocation5 + $0x590] ss:$28 sps:$4 sm:$0xff]  }
  0xe9   :  { %1689 = vmatpush1.bf16.msra.mxu0 %v2484_v54  ;;  %1771 = vmatpush1.bf16.msra.mxu1 %v2487_v55  ;;  %v2553_v54 = vld [vmem:[#allocation5 + $0x208] ss:$28 sps:$4 sm:$0xff]   ;;  %v2557_v55 = vld [vmem:[#allocation5 + $0x3d0] ss:$28 sps:$4 sm:$0xff]  }
  0xea   :  { %1690 = vmatprep.subr.bf16.mxu0 %v2492_v56  ;;  %1772 = vmatprep.subr.bf16.mxu1 %v2495_v57  ;;  %v2560_v56 = vld [vmem:[#allocation5 + $0x244] ss:$28 sps:$4 sm:$0xff]  }
  0xeb   :  { %v2561_v57 = vld [vmem:[#allocation5 + $0x5c8] ss:$28 sps:$4 sm:$0xff]  }
  0xed   :  { %1691 = vmatpush1.bf16.msra.mxu0 %v2490_v58  ;;  %1773 = vmatpush1.bf16.msra.mxu1 %v2493_v59  ;;  %v2558_v58 = vld [vmem:[#allocation5 + $0x240] ss:$28 sps:$4 sm:$0xff]   ;;  %v2562_v59 = vld [vmem:[#allocation5 + $0x408] ss:$28 sps:$4 sm:$0xff]  }
  0xee   :  { %1692 = vmatprep.subr.bf16.mxu0 %v2498_v62  ;;  %1774 = vmatprep.subr.bf16.mxu1 %v2501_v63  ;;  %v2565_v62 = vld [vmem:[#allocation5 + $0x27c] ss:$28 sps:$4 sm:$0xff]  }
  0xef   :  { %v2566_v63 = vld [vmem:[#allocation5 + $0x600] ss:$28 sps:$4 sm:$0xff]  }
  0xf1   :  { %1693 = vmatpush1.bf16.msra.mxu0 %v2496_v0  ;;  %1775 = vmatpush1.bf16.msra.mxu1 %v2499_v2  ;;  %v2563_v0 = vld [vmem:[#allocation5 + $0x278] ss:$28 sps:$4 sm:$0xff]   ;;  %v2567_v2 = vld [vmem:[#allocation5 + $0x440] ss:$28 sps:$4 sm:$0xff]  }
  0xf2   :  { %1694 = vmatprep.subr.bf16.mxu0 %v2504_v3  ;;  %1776 = vmatprep.subr.bf16.mxu1 %v2507_v4  ;;  %v2570_v3 = vld [vmem:[#allocation5 + $0x2b4] ss:$28 sps:$4 sm:$0xff]  }
  0xf3   :  { %v2571_v4 = vld [vmem:[#allocation5 + $0x638] ss:$28 sps:$4 sm:$0xff]  }
  0xf5   :  { %1695 = vmatpush1.bf16.msra.mxu0 %v2502_v5  ;;  %1777 = vmatpush1.bf16.msra.mxu1 %v2505_v8  ;;  %v2568_v5 = vld [vmem:[#allocation5 + $0x2b0] ss:$28 sps:$4 sm:$0xff]   ;;  %v2572_v8 = vld [vmem:[#allocation5 + $0x478] ss:$28 sps:$4 sm:$0xff]  }
  0xf6   :  { %1787 = vmatprep.subr.bf16.mxu0 %v2510_v16  ;;  %2245 = vmatprep.subr.bf16.mxu1 %v2511_v17  ;;  %v2576_v16 = vld [vmem:[#allocation5 + $0x670] ss:$28 sps:$4 sm:$0xff]   ;;  %v2573_v17 = vld [vmem:[#allocation5 + $0x2e8] ss:$28 sps:$4 sm:$0xff]  }
  0xf8   :  { %1697 = vmatmul.mubr.bf16.vlgmr.msra.gmra.mrb[0].mxu0 %v2865_v19  ;;  %1779 = vmatmul.mubr.bf16.vlgmr.msra.gmra.mrb[0].mxu1 %v2865_v19 }
  0xf9   :  { %1788 = vmatpush1.bf16.msra.mxu0 %v2508_v18  ;;  %1819 = vmatprep.mubr.bf16.mxu0 %v2852_v60  ;;  %v2577_v18 = vld [vmem:[#allocation5 + $0x4b0] ss:$28 sps:$4 sm:$0xff]  }
  0xfa   :  { %2246 = vmatpush3.bf16.msra.mxu1 %v2512_v20  ;;  %1901 = vmatprep.mubr.bf16.mxu1 %v2852_v60  ;;  %v2531_v60 = vld [vmem:[#allocation5 + $0x2b8] ss:$28 sps:$4 sm:$0xff]   ;;  %v2580_v20 = vld [vmem:[#allocation5 + $0x324] ss:$28 sps:$4 sm:$0xff]  }
  0xfb   :  { %1789 = vmatprep.subr.bf16.mxu0 %v2515_v21  ;;  %2247 = vmatprep.subr.bf16.mxu1 %v2516_v22  ;;  %v2581_v21 = vld [vmem:[#allocation5 + $0x6a8] ss:$28 sps:$4 sm:$0xff]   ;;  %v2578_v22 = vld [vmem:[#allocation5 + $0x320] ss:$28 sps:$4 sm:$0xff]  }
  0xfd   :  { %1790 = vmatpush1.bf16.msra.mxu0 %v2513_v53  ;;  %v2582_v53 = vld [vmem:[#allocation5 + $0x4e8] ss:$28 sps:$4 sm:$0xff]  }
  0xfe   :  { %2248 = vmatpush3.bf16.msra.mxu1 %v2517_v23  ;;  %1791 = vmatprep.subr.bf16.mxu0 %v2520_v24  ;;  %v2585_v23 = vld [vmem:[#allocation5 + $0x35c] ss:$28 sps:$4 sm:$0xff]  }
  0xff   :  { %2249 = vmatprep.subr.bf16.mxu1 %v2521_v25  ;;  %v2586_v24 = vld [vmem:[#allocation5 + $0x6e0] ss:$28 sps:$4 sm:$0xff]   ;;  %v2583_v25 = vld [vmem:[#allocation5 + $0x358] ss:$28 sps:$4 sm:$0xff]  }
 0x101   :  { %1792 = vmatpush1.bf16.msra.mxu0 %v2518_v26  ;;  %v2587_v26 = vld [vmem:[#allocation5 + $0x520] ss:$28 sps:$4 sm:$0xff]  }
 0x102   :  { %2250 = vmatpush3.bf16.msra.mxu1 %v2522_v27  ;;  %1793 = vmatprep.subr.bf16.mxu0 %v2525_v28  ;;  %v2590_v27 = vld [vmem:[#allocation5 + $0x394] ss:$28 sps:$4 sm:$0xff]  }
 0x103   :  { %2251 = vmatprep.subr.bf16.mxu1 %v2526_v29  ;;  %v2588_v28 = vld [vmem:[#allocation5 + $0x390] ss:$28 sps:$4 sm:$0xff]  }
 0x104   :  { %v2593_v29 = vld [vmem:[#allocation5 + $0x3cc] ss:$28 sps:$4 sm:$0xff]  }
 0x105   :  { %1794 = vmatpush1.bf16.msra.mxu0 %v2523_v30  ;;  %v2591_v30 = vld [vmem:[#allocation5 + $0x3c8] ss:$28 sps:$4 sm:$0xff]  }
 0x106   :  { %2252 = vmatpush3.bf16.msra.mxu1 %v2527_v31  ;;  %1795 = vmatprep.subr.bf16.mxu0 %v2530_v32  ;;  %v2596_v31 = vld [vmem:[#allocation5 + $0x404] ss:$28 sps:$4 sm:$0xff]  }
 0x107   :  { %2253 = vmatprep.subr.bf16.mxu1 %v2531_v60  ;;  %v2594_v32 = vld [vmem:[#allocation5 + $0x400] ss:$28 sps:$4 sm:$0xff]  }
 0x108   :  { %v2599_v60 = vld [vmem:[#allocation5 + $0x43c] ss:$28 sps:$4 sm:$0xff]  }
 0x109   :  { %1796 = vmatpush1.bf16.msra.mxu0 %v2528_v33  ;;  %v2597_v33 = vld [vmem:[#allocation5 + $0x438] ss:$28 sps:$4 sm:$0xff]  }
 0x10a   :  { %2254 = vmatpush3.bf16.msra.mxu1 %v2532_v34  ;;  %1797 = vmatprep.subr.bf16.mxu0 %v2535_v35  ;;  %v2602_v34 = vld [vmem:[#allocation5 + $0x474] ss:$28 sps:$4 sm:$0xff]  }
 0x10b   :  { %2255 = vmatprep.subr.bf16.mxu1 %v2536_v36  ;;  %v2600_v35 = vld [vmem:[#allocation5 + $0x470] ss:$28 sps:$4 sm:$0xff]   ;;  %v2603_v36 = vld [vmem:[#allocation5 + $0x4a8] ss:$28 sps:$4 sm:$0xff]  }
 0x10d   :  { %1798 = vmatpush1.bf16.msra.mxu0 %v2533_v37  ;;  %v2608_v37 = vld [vmem:[#allocation5 + $0x4e4] ss:$28 sps:$4 sm:$0xff]  }
 0x10e   :  { %2256 = vmatpush3.bf16.msra.mxu1 %v2537_v38  ;;  %1799 = vmatprep.subr.bf16.mxu0 %v2540_v39  ;;  %v2611_v38 = vld [vmem:[#allocation5 + $0x51c] ss:$28 sps:$4 sm:$0xff]  }
 0x10f   :  { %2257 = vmatprep.subr.bf16.mxu1 %v2541_v40  ;;  %v2609_v39 = vld [vmem:[#allocation5 + $0x518] ss:$28 sps:$4 sm:$0xff]  }
 0x110   :  { %v2614_v40 = vld [vmem:[#allocation5 + $0x554] ss:$28 sps:$4 sm:$0xff]  }
 0x111   :  { %1800 = vmatpush1.bf16.msra.mxu0 %v2538_v41  ;;  %v2612_v41 = vld [vmem:[#allocation5 + $0x550] ss:$28 sps:$4 sm:$0xff]  }
 0x112   :  { %2258 = vmatpush3.bf16.msra.mxu1 %v2542_v42  ;;  %1801 = vmatprep.subr.bf16.mxu0 %v2545_v43  ;;  %v2617_v42 = vld [vmem:[#allocation5 + $0x58c] ss:$28 sps:$4 sm:$0xff]  }
 0x113   :  { %2259 = vmatprep.subr.bf16.mxu1 %v2546_v44  ;;  %v2615_v43 = vld [vmem:[#allocation5 + $0x588] ss:$28 sps:$4 sm:$0xff]  }
 0x114   :  { %v2620_v44 = vld [vmem:[#allocation5 + $0x5c4] ss:$28 sps:$4 sm:$0xff]  }
 0x115   :  { %1802 = vmatpush1.bf16.msra.mxu0 %v2543_v45  ;;  %v2618_v45 = vld [vmem:[#allocation5 + $0x5c0] ss:$28 sps:$4 sm:$0xff]  }
 0x116   :  { %2260 = vmatpush3.bf16.msra.mxu1 %v2547_v46  ;;  %1803 = vmatprep.subr.bf16.mxu0 %v2550_v47  ;;  %v2623_v46 = vld [vmem:[#allocation5 + $0x5fc] ss:$28 sps:$4 sm:$0xff]  }
 0x117   :  { %2267 = vmatprep.subr.bf16.mxu1 %v2551_v48  ;;  %v2621_v47 = vld [vmem:[#allocation5 + $0x5f8] ss:$28 sps:$4 sm:$0xff]  }
 0x118   :  { %v2626_v48 = vld [vmem:[#allocation5 + $0x634] ss:$28 sps:$4 sm:$0xff]  }
 0x119   :  { %1902 = vmatmul.mubr.bf16.vlgmr.msra.gmra.mrb[4].mxu1 %v2854_v61  ;;  %1804 = vmatpush1.bf16.msra.mxu0 %v2548_v49  ;;  %v2624_v49 = vld [vmem:[#allocation5 + $0x630] ss:$28 sps:$4 sm:$0xff]  }
 0x11a   :  { %2268 = vmatpush3.bf16.msra.mxu1 %v2552_v50  ;;  %1941 = vmatprep.mubr.bf16.mxu1 %v2860_v1  ;;  %v2629_v50 = vld [vmem:[#allocation5 + $0x66c] ss:$28 sps:$4 sm:$0xff]  }
 0x11b   :  { %1805 = vmatprep.subr.bf16.mxu0 %v2555_v51  ;;  %2269 = vmatprep.subr.bf16.mxu1 %v2556_v52  ;;  %v2627_v51 = vld [vmem:[#allocation5 + $0x668] ss:$28 sps:$4 sm:$0xff]  }
 0x11c   :  { %v2632_v52 = vld [vmem:[#allocation5 + $0x6a4] ss:$28 sps:$4 sm:$0xff]  }
 0x11d   :  { %1806 = vmatpush1.bf16.msra.mxu0 %v2553_v54  ;;  %v2630_v54 = vld [vmem:[#allocation5 + $0x6a0] ss:$28 sps:$4 sm:$0xff]  }
 0x11e   :  { %2270 = vmatpush3.bf16.msra.mxu1 %v2557_v55  ;;  %1807 = vmatprep.subr.bf16.mxu0 %v2560_v56  ;;  %v2635_v55 = vld [vmem:[#allocation5 + $0x6dc] ss:$28 sps:$4 sm:$0xff]  }
 0x11f   :  { %2271 = vmatprep.subr.bf16.mxu1 %v2561_v57  ;;  %v2633_v56 = vld [vmem:[#allocation5 + $0x6d8] ss:$28 sps:$4 sm:$0xff]   ;;  %v2880_v57 = vld [vmem:[%s2915_s4] sm:$0xff]  ;;  %s2742_s4 = smov [#allocation7]  }
 0x120   :  { %s2004_s21 = sshll.u32 %s2742_s4, 4  ;;  %s2005_s21 = int_to_ptr.vmem [resolvable:$true] %s2004_s21 }
 0x121   :  { %1808 = vmatpush1.bf16.msra.mxu0 %v2558_v58  ;;  %v439_v58 = vrot.slane %v2880_v57, %v2814_v9  ;;  %s2708_s22 = scalar_lea.vmem %s2005_s21, 896  ;;  %p2713_p3 = scmp.lt.s32.totalorder %s2005_s21, %s2005_s21 }
 0x122   :  { %2272 = vmatpush3.bf16.msra.mxu1 %v2562_v59  ;;  %1809 = vmatprep.subr.bf16.mxu0 %v2565_v62  ;;  %v447_v59 = vrot.slane %v2880_v57, %v2817_v10  ;;  %v443_v62 = vrot.slane %v2880_v57, %v2823_v13  ;;  %p2709_p2 = scmp.ne.s32.totalorder %s2005_s21, %s2708_s22  ;;  %p2714_p4 = scmp.lt.s32.totalorder %s2708_s22, %s2708_s22 }
 0x123   :  { %2273 = vmatprep.subr.bf16.mxu1 %v2566_v63  ;;  %v451_v63 = vrot.slane %v2880_v57, %v2826_v14 }
 0x124   :  { %p2715_p5 = por %p2714_p4, %p2713_p3 }
 0x125   :  { %1810 = vmatpush1.bf16.msra.mxu0 %v2563_v0 }
 0x126   :  { %2274 = vmatpush3.bf16.msra.mxu1 %v2567_v2  ;;  %1811 = vmatprep.subr.bf16.mxu0 %v2570_v3  ;;  %p2716_p6 = pnand %p2715_p5, %p2709_p2 }
 0x127   :  { %2275 = vmatprep.subr.bf16.mxu1 %v2571_v4 }
 0x129   :  { %1812 = vmatpush1.bf16.msra.mxu0 %v2568_v5 }
 0x12a   :  { %2276 = vmatpush3.bf16.msra.mxu1 %v2572_v8  ;;  %1813 = vmatprep.subr.bf16.mxu0 %v2575_v12 }
 0x12b   :  { %2277 = vmatprep.subr.bf16.mxu1 %v2576_v16 }
 0x12d   :  { %1814 = vmatpush1.bf16.msra.mxu0 %v2573_v17 }
 0x12e   :  { %2278 = vmatpush3.bf16.msra.mxu1 %v2577_v18  ;;  %1815 = vmatprep.subr.bf16.mxu0 %v2580_v20 }
 0x12f   :  { %2279 = vmatprep.subr.bf16.mxu1 %v2581_v21 }
 0x131   :  { %1816 = vmatpush1.bf16.msra.mxu0 %v2578_v22 }
 0x132   :  { %2280 = vmatpush3.bf16.msra.mxu1 %v2582_v53  ;;  %1817 = vmatprep.subr.bf16.mxu0 %v2585_v23 }
 0x133   :  { %2281 = vmatprep.subr.bf16.mxu1 %v2586_v24 }
 0x135   :  { %1818 = vmatpush1.bf16.msra.mxu0 %v2583_v25 }
 0x136   :  { %2282 = vmatpush3.bf16.msra.mxu1 %v2587_v26  ;;  %1828 = vmatprep.subr.bf16.mxu0 %v2590_v27 }
 0x138   :  { %1820 = vmatmul.mubr.bf16.vlgmr.msra.gmra.mrb[4].mxu0 %v2854_v61  ;;  %v2605_v61 = vld [vmem:[#allocation5 + $0x4ac] ss:$28 sps:$4 sm:$0xff]  }
 0x139   :  { %1942 = vmatmul.mubr.bf16.vlgmr.msra.gmra.mrb[8].mxu1 %v2865_v19  ;;  %1829 = vmatpush1.bf16.msra.mxu0 %v2588_v28 }
 0x13a   :  { %1860 = vmatprep.mubr.bf16.mxu0 %v2860_v1  ;;  %1830 = vmatprep.subr.bf16.mxu0 %v2593_v29  ;;  %v2606_v1 = vld [vmem:[#allocation5 + $0x4e0] ss:$28 sps:$4 sm:$0xff]  }
 0x13d   :  { %1831 = vmatpush1.bf16.msra.mxu0 %v2591_v30 }
 0x13e   :  { %1832 = vmatprep.subr.bf16.mxu0 %v2596_v31 }
 0x141   :  { %1833 = vmatpush1.bf16.msra.mxu0 %v2594_v32 }
 0x142   :  { %1834 = vmatprep.subr.bf16.mxu0 %v2599_v60 }
 0x145   :  { %1835 = vmatpush1.bf16.msra.mxu0 %v2597_v33 }
 0x146   :  { %1836 = vmatprep.subr.bf16.mxu0 %v2602_v34 }
 0x149   :  { %1837 = vmatpush1.bf16.msra.mxu0 %v2600_v35 }
 0x14a   :  { %1838 = vmatprep.subr.bf16.mxu0 %v2605_v61  ;;  %v463_v61 = vrot.slane %v2880_v57, %v70_v11  ;;  %v459_v11 = vrot.slane %v2880_v57, %v110_v15 }
 0x14d   :  { %1839 = vmatpush1.bf16.msra.mxu0 %v2603_v36 }
 0x14e   :  { %1840 = vmatprep.subr.bf16.mxu0 %v2608_v37 }
 0x151   :  { %1841 = vmatpush1.bf16.msra.mxu0 %v2606_v1 }
 0x152   :  { %1842 = vmatprep.subr.bf16.mxu0 %v2611_v38 }
 0x155   :  { %1843 = vmatpush1.bf16.msra.mxu0 %v2609_v39 }
 0x156   :  { %1844 = vmatprep.subr.bf16.mxu0 %v2614_v40 }
 0x159   :  { %1845 = vmatpush1.bf16.msra.mxu0 %v2612_v41 }
 0x15a   :  { %1846 = vmatprep.subr.bf16.mxu0 %v2617_v42 }
 0x15d   :  { %1847 = vmatpush1.bf16.msra.mxu0 %v2615_v43 }
 0x15e   :  { %1848 = vmatprep.subr.bf16.mxu0 %v2620_v44 }
 0x161   :  { %1849 = vmatpush1.bf16.msra.mxu0 %v2618_v45 }
 0x162   :  { %1850 = vmatprep.subr.bf16.mxu0 %v2623_v46  ;;  %v455_v46 = vrot.slane %v2880_v57, %v66_v7 }
 0x165   :  { %1851 = vmatpush1.bf16.msra.mxu0 %v2621_v47 }
 0x166   :  { %1852 = vmatprep.subr.bf16.mxu0 %v2626_v48 }
 0x169   :  { %1853 = vmatpush1.bf16.msra.mxu0 %v2624_v49 }
 0x16a   :  { %1854 = vmatprep.subr.bf16.mxu0 %v2629_v50 }
 0x16d   :  { %1855 = vmatpush1.bf16.msra.mxu0 %v2627_v51 }
 0x16e   :  { %1856 = vmatprep.subr.bf16.mxu0 %v2632_v52 }
 0x171   :  { %1857 = vmatpush1.bf16.msra.mxu0 %v2630_v54 }
 0x172   :  { %1858 = vmatprep.subr.bf16.mxu0 %v2635_v55 }
 0x175   :  { %1859 = vmatpush1.bf16.msra.mxu0 %v2633_v56 }
 0x178   :  { %1861 = vmatmul.mubr.bf16.vlgmr.msra.gmra.mrb[4].mxu0 %v2865_v19 }
 0x1cb   :  { %v1698_v0 = vpop.f32.mrb[0].mxu0  ;;  %v1780_v2 = vpop.f32.mrb[0].mxu1 }
 0x1cc   :  { %v2289_v19 = vadd.f32 %v1698_v0, %v439_v58  ;;  %v2291_v3 = vadd.f32 %v1780_v2, %v447_v59  ;;  %v1700_v4 = vpop.f32.mrb[1].mxu0  ;;  %v1782_v5 = vpop.f32.mrb[1].mxu1 }
 0x1cd   :  { %v2290_v8 = vadd.f32 %v1700_v4, %v443_v62  ;;  %v2292_v12 = vadd.f32 %v1782_v5, %v451_v63  ;;  %v1702_v16 = vpop.f32.mrb[2].mxu0  ;;  %v1784_v17 = vpop.f32.mrb[2].mxu1 }
 0x1ce   :  { %v2238_v9 = vmul.f32 -1.442695, %v2289_v19  ;;  %v2240_v18 = vmul.f32 -1.442695, %v2291_v3  ;;  %v1703_v20 = vpop.f32.mrb[3].mxu0  ;;  %v1785_v10 = vpop.f32.mrb[3].mxu1 }
 0x1cf   :  { %v2239_v21 = vmul.f32 -1.442695, %v2290_v8  ;;  %v2241_v22 = vmul.f32 -1.442695, %v2292_v12 }
 0x1d0   :  { %2636 = vpow2.f32 %v2238_v9 }
 0x1d1   :  { %2638 = vpow2.f32 %v2240_v18 }
 0x1d2   :  { %2640 = vpow2.f32 %v2239_v21 }
 0x1d3   :  { %2642 = vpow2.f32 %v2241_v22 }
 0x1da   :  { %v2637_v13 = vpop.eup %2636 }
 0x1db   :  { %v2639_v14 = vpop.eup %2638  ;;  %v1970_v53 = vadd.f32 1.0, %v2637_v13 }
 0x1dc   :  { %v2641_v23 = vpop.eup %2640  ;;  %v1972_v24 = vadd.f32 1.0, %v2639_v14 }
 0x1dd   :  { %v2643_v25 = vpop.eup %2642  ;;  %2644 = vrcp.f32 %v1970_v53  ;;  %v1971_v26 = vadd.f32 1.0, %v2641_v23 }
 0x1de   :  { %2646 = vrcp.f32 %v1972_v24  ;;  %v1973_v27 = vadd.f32 1.0, %v2643_v25 }
 0x1df   :  { %2648 = vrcp.f32 %v1971_v26 }
 0x1e0   :  { %2650 = vrcp.f32 %v1973_v27 }
 0x1e7   :  { %v2645_v28 = vpop.eup %2644 }
 0x1e8   :  { %v2647_v29 = vpop.eup %2646  ;;  %1991 = vst [vmem:[#allocation7] sm:$0xff] %v2645_v28 }
 0x1e9   :  { %v2649_v30 = vpop.eup %2648  ;;  %1993 = vst [vmem:[#allocation7 + $0x10] sm:$0xff] %v2647_v29 }
 0x1ea   :  { %v2651_v31 = vpop.eup %2650  ;;  %1992 = vst [vmem:[#allocation7 + $0x8] sm:$0xff] %v2649_v30 }
 0x1eb   :  { %1994 = vst [vmem:[#allocation7 + $0x18] sm:$0xff] %v2651_v31 }
 0x1ec   :  { %v2261_v32 = vpop.f32.mrb[4].mxu1 }
 0x1ed   :  { %v2262_v60 = vpop.f32.mrb[5].mxu1 }
 0x1ee   :  { %v2263_v33 = vadd.f32 %v2262_v60, %v2261_v32  ;;  %v2264_v34 = vpop.f32.mrb[6].mxu1 }
 0x1ef   :  { %v2265_v35 = vpop.f32.mrb[7].mxu1 }
 0x1f0   :  { %v1904_v1 = vadd.f32 %v2263_v33, %v463_v61 }
 0x20c   :  { %v2283_v36 = vpop.f32.mrb[8].mxu1 }
 0x20d   :  { %v2284_v37 = vpop.f32.mrb[9].mxu1 }
 0x20e   :  { %v2285_v38 = vadd.f32 %v2284_v37, %v2283_v36  ;;  %v2286_v39 = vpop.f32.mrb[10].mxu1 }
 0x20f   :  { %v2287_v40 = vpop.f32.mrb[11].mxu1 }
 0x210   :  { %v1944_v41 = vadd.f32 %v2285_v38, %v1904_v1 }
 0x212   :  { %v2244_v42 = vmul.f32 -1.442695, %v1944_v41 }
 0x214   :  { %2652 = vpow2.f32 %v2244_v42 }
 0x21e   :  { %v2653_v43 = vpop.eup %2652 }
 0x21f   :  { %v1976_v44 = vadd.f32 1.0, %v2653_v43 }
 0x221   :  { %2654 = vrcp.f32 %v1976_v44 }
 0x22b   :  { %v2655_v45 = vpop.eup %2654 }
 0x22c   :  { %1997 = vst [vmem:[#allocation7 + $0x30] sm:$0xff] %v2655_v45 }
 0x24b   :  { %v1862_v47 = vpop.f32.mrb[4].mxu0 }
 0x24c   :  { %v2293_v48 = vadd.f32 %v1862_v47, %v455_v46  ;;  %v1864_v49 = vpop.f32.mrb[5].mxu0 }
 0x24d   :  { %v2294_v50 = vadd.f32 %v1864_v49, %v459_v11  ;;  %v1866_v51 = vpop.f32.mrb[6].mxu0 }
 0x24e   :  { %v2242_v52 = vmul.f32 -1.442695, %v2293_v48  ;;  %v1867_v54 = vpop.f32.mrb[7].mxu0 }
 0x24f   :  { %v2243_v55 = vmul.f32 -1.442695, %v2294_v50 }
 0x250   :  { %2656 = vpow2.f32 %v2242_v52 }
 0x251   :  { %2658 = vpow2.f32 %v2243_v55 }
 0x25a   :  { %v2657_v56 = vpop.eup %2656 }
 0x25b   :  { %v2659_v58 = vpop.eup %2658  ;;  %v1974_v59 = vadd.f32 1.0, %v2657_v56 }
 0x25c   :  { %v1975_v62 = vadd.f32 1.0, %v2659_v58 }
 0x25d   :  { %2660 = vrcp.f32 %v1974_v59 }
 0x25e   :  { %2662 = vrcp.f32 %v1975_v62 }
 0x267   :  { %v2661_v6 = vpop.eup %2660 }
 0x268   :  { %v2663_v7 = vpop.eup %2662  ;;  %1995 = vst [vmem:[#allocation7 + $0x20] sm:$0xff] %v2661_v6 }
 0x269   :  { %1996 = vst [vmem:[#allocation7 + $0x28] sm:$0xff] %v2663_v7 }
 0x26a   :  { %2719 = shalt.err (!%p2716_p6)
}
 0x26b   :  { %s2720_s25 = scalar_lea.hbm %s2916_s5, 896 }
 0x26c   :  { %p2721_p7 = scmp.ne.s32.totalorder %s2916_s5, %s2720_s25  ;;  %p2724_p8 = scmp.lt.u32.totalorder %s2720_s25, %s2916_s5 }
 0x26e   :  { %p2726_p9 = pnand %p2724_p8, %p2721_p7 }
 0x270   :  { %2729 = shalt.err (!%p2726_p9)
}
 0x271   :  { %2007 = dma.vmem_to_hbm [thread:$0]  %s2005_s21, 896, %s2916_s5, [#allocation4]  }
 0x272   :  { %2734 = dma.done.wait [#allocation4], 896  }
 0x273   :  { %2735 = vsyncadd [#allocation4], 4294966400 }
 0x274   :  { %2011 = vsyncpa [#allocation3], 1 }
 0x275   :  { %2012 = vsyncpa [#allocation6], 1 }
 0x276   :  { %2013 = vsyncpa [#allocation4], 1 }

</bundles_post_ra>
